<compile_context>
chip_gen: v5e
topology: v5e:2x2
jax: 0.10.0
libtpu: 0.0.40
codegen_flags: <defaults>
</compile_context>

<pallas_src>
import jax
import jax.numpy as jnp
from jax.experimental import pallas as pl
from jax.experimental.pallas import tpu as pltpu

F32 = jnp.float32
SUBLANE = 8     # vreg sublane width (second-to-last dim)


# ---------------------------------------------------------------------------
# Kernel: y_tile = x_tile @ W + b      (W stored [in, out]; b stored [1, out])
# ---------------------------------------------------------------------------
def fcl_kernel(x_ref, w_ref, b_ref, o_ref):
    o_ref[...] = (
        jnp.dot(x_ref[...], w_ref[...], preferred_element_type=jnp.float32)
        + b_ref[...]
    ).astype(o_ref.dtype)


def _choose_tm(m, k, itemsize, tm_max=1024, budget_bytes=8 << 20):
    """Row-tile size: double-buffered x tile kept under ~8 MiB, multiple of 8."""
    rows = budget_bytes // max(1, 2 * k * itemsize)
    rows = max(SUBLANE, (rows // SUBLANE) * SUBLANE)
    tm = min(tm_max, rows)
    if m <= tm:
        # Single block covering the whole row axis: block dims equal the full
        # array dims, so the (8,128) divisibility rule does not apply.
        return m
    return tm


# ---------------------------------------------------------------------------
# Wrapper
# ---------------------------------------------------------------------------
def make_fcl(w, b, *, use_bf16_inputs=False):
    """Build FCL.forward.

    w: [input_size, output_size]  (transposed vs. PyTorch nn.Linear.weight)
    b: [output_size]
    use_bf16_inputs: cast x/W to bf16 (halves x HBM traffic for large M,
                     mostly a v5e win); accumulation stays f32.
    """
    K, N = w.shape
    in_dtype = jnp.bfloat16 if use_bf16_inputs else F32
    wk = jnp.asarray(w, in_dtype)                       # [K, N], VMEM-resident
    bk = jnp.asarray(b, F32).reshape(1, N)              # [1, N], f32 bias

    def forward(gcn_output):
        M, Kx = gcn_output.shape
        assert Kx == K, f"expected feature dim {K}, got {Kx}"
        x = gcn_output.astype(in_dtype)

        tm = _choose_tm(M, K, jnp.dtype(in_dtype).itemsize)
        grid = (pl.cdiv(M, tm),)

        return pl.pallas_call(
            fcl_kernel,
            out_shape=jax.ShapeDtypeStruct((M, N), F32),
            grid=grid,
            in_specs=[
                pl.BlockSpec((tm, K), lambda i: (i, 0)),   # x row tiles
                pl.BlockSpec((K, N), lambda i: (0, 0)),    # W resident
                pl.BlockSpec((1, N), lambda i: (0, 0)),    # b resident
            ],
            out_specs=pl.BlockSpec((tm, N), lambda i: (i, 0)),
            compiler_params=pltpu.CompilerParams(
                dimension_semantics=("parallel",)),
        )(x, wk, bk)

    return forward


if __name__ == "__main__":
    key = jax.random.PRNGKey(0)
    kx, kw, kb, kx2 = jax.random.split(key, 4)

    # Small shapes consistent with the module: a batch of GCN embeddings
    # mapped from input_size=48 features to output_size=8.
    BATCH, INPUT_SIZE, OUTPUT_SIZE = 16, 48, 8

    x = jax.random.normal(kx, (BATCH, INPUT_SIZE), F32)
    # nn.Linear-style init: U(-1/sqrt(fan_in), 1/sqrt(fan_in)); stored [in, out].
    bound = 1.0 / (INPUT_SIZE ** 0.5)
    w = jax.random.uniform(kw, (INPUT_SIZE, OUTPUT_SIZE), F32, -bound, bound)
    b = jax.random.uniform(kb, (OUTPUT_SIZE,), F32, -bound, bound)

    fcl_forward = jax.jit(make_fcl(w, b))

    out = jax.block_until_ready(fcl_forward(x))
    ref = x @ w + b
    assert out.shape == (BATCH, OUTPUT_SIZE), out.shape
    assert bool(jnp.all(jnp.isfinite(out)))
    assert jnp.allclose(out, ref, atol=1e-5, rtol=1e-5), float(
        jnp.max(jnp.abs(out - ref))
    )

    # Second call with a non-8-aligned batch to exercise the full-array
    # (exempt) block path / masked stores.
    x2 = jax.random.normal(kx2, (13, INPUT_SIZE), F32)
    out2 = jax.block_until_ready(fcl_forward(x2))
    ref2 = x2 @ w + b
    assert out2.shape == (13, OUTPUT_SIZE), out2.shape
    assert jnp.allclose(out2, ref2, atol=1e-5, rtol=1e-5), float(
        jnp.max(jnp.abs(out2 - ref2))
    )

    print("KERNEL_OK")
</pallas_src>

<mosaic_0001>
module attributes {stable_mosaic.version = 11 : i64} {
  func.func @fcl_kernel(%arg0: i32, %arg1: memref<16x48xf32, #tpu.memory_space<vmem>>, %arg2: memref<48x8xf32, #tpu.memory_space<vmem>>, %arg3: memref<1x8xf32, #tpu.memory_space<vmem>>, %arg4: memref<16x8xf32, #tpu.memory_space<vmem>>) attributes {dimension_semantics = [#tpu.dimension_semantics<parallel>], iteration_bounds = array<i64: 1>, scalar_prefetch = 0 : i64, scratch_operands = 0 : i64, tpu.core_type = #tpu.core_type<tc>, window_params = [{transform_indices = @transform_0, window_bounds = array<i64: 16, 48>}, {pipeline_mode = #tpu.pipeline_mode<synchronous>, transform_indices = @transform_1, window_bounds = array<i64: 48, 8>}, {pipeline_mode = #tpu.pipeline_mode<synchronous>, transform_indices = @transform_2, window_bounds = array<i64: 1, 8>}, {transform_indices = @transform_3, window_bounds = array<i64: 16, 8>}]} {
    %c0 = arith.constant 0 : index
    %c0_0 = arith.constant 0 : index
    %0 = vector.load %arg1[%c0, %c0_0] : memref<16x48xf32, #tpu.memory_space<vmem>>, vector<16x48xf32>
    %c0_1 = arith.constant 0 : index
    %c0_2 = arith.constant 0 : index
    %1 = vector.load %arg2[%c0_1, %c0_2] : memref<48x8xf32, #tpu.memory_space<vmem>>, vector<48x8xf32>
    %cst = arith.constant dense<0.000000e+00> : vector<16x8xf32>
    %2 = tpu.matmul %0, %1, %cst {dimension_numbers = #tpu.dot_dimension_numbers<[1], [0], [0], [1], [0, 0, 1, 1], [], []>} : vector<16x48xf32>, vector<48x8xf32>, vector<16x8xf32> -> vector<16x8xf32>
    %c0_3 = arith.constant 0 : index
    %c0_4 = arith.constant 0 : index
    %3 = vector.load %arg3[%c0_3, %c0_4] : memref<1x8xf32, #tpu.memory_space<vmem>>, vector<1x8xf32>
    %4 = vector.broadcast %3 : vector<1x8xf32> to vector<16x8xf32>
    %5 = arith.addf %2, %4 : vector<16x8xf32>
    %c0_5 = arith.constant 0 : index
    %c0_6 = arith.constant 0 : index
    %6 = vector.load %arg4[%c0_5, %c0_6] : memref<16x8xf32, #tpu.memory_space<vmem>>, vector<16x8xf32>
    tpu.vector_store %arg4[%c0_5, %c0_6], %5 {strides = array<i32>} : memref<16x8xf32, #tpu.memory_space<vmem>>, vector<16x8xf32>,
    return
  }
  func.func @transform_0(%arg0: i32) -> (i32, i32) {
    %c0_i32 = arith.constant 0 : i32
    %c0_i32_0 = arith.constant 0 : i32
    return %arg0, %c0_i32 : i32, i32
  }
  func.func @transform_1(%arg0: i32) -> (i32, i32) {
    %c0_i32 = arith.constant 0 : i32
    %c0_i32_0 = arith.constant 0 : i32
    %c0_i32_1 = arith.constant 0 : i32
    return %c0_i32, %c0_i32_0 : i32, i32
  }
  func.func @transform_2(%arg0: i32) -> (i32, i32) {
    %c0_i32 = arith.constant 0 : i32
    %c0_i32_0 = arith.constant 0 : i32
    %c0_i32_1 = arith.constant 0 : i32
    return %c0_i32, %c0_i32_0 : i32, i32
  }
  func.func @transform_3(%arg0: i32) -> (i32, i32) {
    %c0_i32 = arith.constant 0 : i32
    %c0_i32_0 = arith.constant 0 : i32
    return %arg0, %c0_i32 : i32, i32
  }
}

</mosaic_0001>

<bundles_post_ra>
// kernel: forward.1
= control target key start
LH: loop header
LB: loop body
LE: loop exit
PB: predicated region body
PF: predicated region fallthrough
CT: control target
= control target key end

     0   :  { %8 = vsyncpa [#allocation3], 0  ;;  %s201_s0 = inlined_call_operand.hbm [shape: f32[16,48], index: 0, kind: input, shape index: {}]   ;;  %s202_s1 = inlined_call_operand.hbm [shape: f32[48,8], index: 1, kind: input, shape index: {}]   ;;  %s203_s2 = inlined_call_operand.vmem [shape: f32[1,8], index: 2, kind: input, shape index: {}]   ;;  %s204_s3 = inlined_call_operand.vmem [shape: f32[16,8], index: 3, kind: output, shape index: {}]  }
   0x1   :  { %s14_s14 = sshll.u32 %s201_s0, 4  ;;  %s15_s14 = int_to_ptr.hbm [resolvable:$true] %s14_s14 }
   0x2   :  { %9 = vsyncpa [#allocation5], 0  ;;  %s162_s15 = smov [#allocation2]   ;;  %s27_s19 = sshll.u32 %s202_s1, 4  ;;  %s28_s19 = int_to_ptr.hbm [resolvable:$true] %s27_s19 }
   0x3   :  { %s16_s16 = sshll.u32 %s162_s15, 4  ;;  %s163_s20 = smov 128   ;;  %s17_s16 = int_to_ptr.vmem [resolvable:$true] %s16_s16 }
   0x4   :  { %s164_s21 = smov 8   ;;  %s165_s22 = smov [#allocation4]  }
   0x5   :  { %22 = dma.hbm_to_vmem [thread:$0]  %s15_s14, 256, %s17_s16, [#allocation3], %s163_s20, %s163_s20, %s164_s21  }
   0x6   :  { %s29_s23 = sshll.u32 %s165_s22, 4  ;;  %s30_s23 = int_to_ptr.vmem [resolvable:$true] %s29_s23 }
   0x7   :  { %35 = dma.hbm_to_vmem [thread:$0]  %s28_s19, 768, %s30_s23, [#allocation5], %s163_s20, %s163_s20, %s164_s21  }
   0x8   :  { %158 = dma.done.wait [#allocation3], 256  }
   0x9   :  { %159 = vsyncadd [#allocation3], 4294967040 }
   0xa   :  { %160 = dma.done.wait [#allocation5], 768  }
   0xb   :  { %161 = vsyncadd [#allocation5], 4294966528  ;;  %v53_v0 = vld [vmem:[#allocation4 + $0x28] sm:$0xff]  ;;  %v52_v1 = vld [vmem:[#allocation4 + $0x20] sm:$0xff]  ;;  %vm58_vm0 = vcmask 392192   ;;  %vm88_vm1 = vcmask 64512  }
   0xc   :  { %75 = vmatpush.msra.mxu0 %v53_v0  ;;  %99 = vmatpush.msra.mxu1 %v53_v0  ;;  %v51_v2 = vld [vmem:[#allocation4 + $0x18] sm:$0xff]  ;;  %v50_v3 = vld [vmem:[#allocation4 + $0x10] sm:$0xff]  ;;  %v49_v4 = vld [vmem:[#allocation4 + $0x8] sm:$0xff] }
   0xd   :  { %v48_v5 = vld [vmem:[#allocation4] sm:$0xff]  ;;  %v46_v6 = vld [vmem:[#allocation2] sm:$0xff]  ;;  %v47_v7 = vld [vmem:[#allocation2 + $0x8] sm:$0xff] }
   0xe   :  { %76 = vmatpush.msra.mxu0 %v52_v1  ;;  %100 = vmatpush.msra.mxu1 %v52_v1  ;;  %v109_v8 = vld [vmem:[%s203_s2] ss:$0 sm:$0xff] }
  0x10   :  { %77 = vmatpush.msra.mxu0 %v51_v2  ;;  %101 = vmatpush.msra.mxu1 %v51_v2 }
  0x12   :  { %78 = vmatpush.msra.mxu0 %v50_v3  ;;  %102 = vmatpush.msra.mxu1 %v50_v3 }
  0x14   :  { %79 = vmatpush.msra.mxu0 %v49_v4  ;;  %103 = vmatpush.msra.mxu1 %v49_v4 }
  0x16   :  { %80 = vmatpush.msra.mxu0 %v48_v5  ;;  %104 = vmatpush.msra.mxu1 %v48_v5 }
  0x17   :  { %97 = vmatmul.msk.f32.vlgmr.msra.gmra.mxu0 %vm58_vm0, %v46_v6  ;;  %98 = vmatmul.msk.f32.vlgmr.msra.gmra.mxu1 %vm58_vm0, %v47_v7 }
  0x94   :  { %v82_v9 = vpop.f32.mrf.mxu0  ;;  %v85_v10 = vpop.f32.mrf.mxu1 }
  0x95   :  { %v83_v11 = vadd.f32 %v109_v8, %v82_v9  ;;  %v86_v12 = vadd.f32 %v109_v8, %v85_v10 }
  0x97   :  { %89 = vst.msk [vmem:[%s204_s3] sm:$0xff] %vm88_vm1, %v83_v11 }
  0x98   :  { %90 = vst.msk [vmem:[%s204_s3 + $0x8] sm:$0xff] %vm88_vm1, %v86_v12 }
  0x99   :  { %95 = vsyncpa [#allocation3], 1 }
  0x9a   :  { %96 = vsyncpa [#allocation5], 1 }

</bundles_post_ra>
